<compile_context>
chip_gen: v6e
topology: v6e:2x2x1
jax: 0.10.0
libtpu: 0.0.40
codegen_flags: <defaults>
</compile_context>

<pallas_src>
import jax
import jax.numpy as jnp
from jax.experimental import pallas as pl
from jax.experimental.pallas import tpu as pltpu


def _pad8(n: int) -> int:
    return -(-n // 8) * 8


# ----------------------------- fused Pallas kernel -------------------------- #

def _make_dt_kernel(*, B, HW, P, hidden, act_dim, K_img, K_small):
    """Builds the fused kernel with all layout constants closed over (static)."""
    # static row offsets into the packed weight slab
    o_pose = K_img
    o_goal = o_pose + K_small
    o_act = o_goal + K_small
    o_w1 = o_act + K_small
    o_w2 = o_w1 + 4 * hidden
    # static row offsets into the packed small-activation slab
    s_goal = _pad8(B * P)
    s_act = s_goal + _pad8(B)

    def kernel(patches_ref, small_ref, w_ref, b_ref, out_ref):
        # ---- image encoder: im2col conv matmul (bf16 in, f32 acc) + ReLU,
        #      then global-average-pool via reshape + mean (XLU; MXU stays free).
        feat = jnp.maximum(
            jnp.dot(patches_ref[...], w_ref[0:K_img, :],
                    preferred_element_type=jnp.float32) + b_ref[0:1, :], 0.0)
        img_emb = jnp.mean(feat.reshape(B, HW, hidden), axis=1)        # (B, hidden)

        # ---- pose encoder: per-pose Linear + ReLU, mean over poses.
        pose_feat = jnp.maximum(
            jnp.dot(small_ref[0:B * P, :], w_ref[o_pose:o_pose + K_small, :],
                    preferred_element_type=jnp.float32) + b_ref[1:2, :], 0.0)
        pose_emb = jnp.mean(pose_feat.reshape(B, P, hidden), axis=1)   # (B, hidden)

        # ---- goal / action encoders (zero-padded features contribute nothing).
        goal_emb = jnp.maximum(
            jnp.dot(small_ref[s_goal:s_goal + B, :], w_ref[o_goal:o_goal + K_small, :],
                    preferred_element_type=jnp.float32) + b_ref[2:3, :], 0.0)
        act_emb = jnp.maximum(
            jnp.dot(small_ref[s_act:s_act + B, :], w_ref[o_act:o_act + K_small, :],
                    preferred_element_type=jnp.float32) + b_ref[3:4, :], 0.0)

        # ---- fusion MLP: one K = 4*hidden matmul on the lane-concatenated
        #      embedding (instead of four padded K=hidden MXU passes).
        fused = jnp.concatenate([img_emb, pose_emb, goal_emb, act_emb],
                                axis=-1).astype(jnp.bfloat16)          # (B, 4*hidden)
        h = jnp.maximum(
            jnp.dot(fused, w_ref[o_w1:o_w1 + 4 * hidden, :],
                    preferred_element_type=jnp.float32) + b_ref[4:5, :], 0.0)
        out = jnp.dot(h.astype(jnp.bfloat16), w_ref[o_w2:o_w2 + hidden, :],
                      preferred_element_type=jnp.float32) + b_ref[5:6, :]
        out_ref[...] = out[:, 0:act_dim]

    return kernel


# ------------------------------- model glue --------------------------------- #

def _im2col_3x3_same(images):
    """images: (B, C, H, W) NCHW -> patches (B*H*W, C*9) matching PyTorch
    Conv2d weight layout (out, in, kh, kw) flattened as (in*kh*kw)."""
    B, C, H, W = images.shape
    xp = jnp.pad(images, ((0, 0), (0, 0), (1, 1), (1, 1)))
    pieces = [xp[:, :, ki:ki + H, kj:kj + W] for ki in range(3) for kj in range(3)]
    patches = jnp.stack(pieces, axis=2)                     # (B, C, 9, H, W)
    patches = patches.transpose(0, 3, 4, 1, 2)              # (B, H, W, C, 9)
    return patches.reshape(B * H * W, C * 9)


def init_params(key, *, in_ch, hidden, pose_dim, goal_dim, act_dim):
    def uniform(k, shape, fan_in):
        bound = 1.0 / jnp.sqrt(float(fan_in))
        return jax.random.uniform(k, shape, jnp.float32, -bound, bound)

    ks = jax.random.split(key, 12)
    p = {}
    p["conv_w"] = uniform(ks[0], (hidden, in_ch, 3, 3), in_ch * 9)  # PyTorch Conv2d layout
    p["conv_b"] = uniform(ks[1], (hidden,), in_ch * 9)
    p["pose_w"] = uniform(ks[2], (pose_dim, hidden), pose_dim)
    p["pose_b"] = uniform(ks[3], (hidden,), pose_dim)
    p["goal_w"] = uniform(ks[4], (goal_dim, hidden), goal_dim)
    p["goal_b"] = uniform(ks[5], (hidden,), goal_dim)
    p["act_w"] = uniform(ks[6], (act_dim, hidden), act_dim)
    p["act_b"] = uniform(ks[7], (hidden,), act_dim)
    p["fuse_w1"] = uniform(ks[8], (4 * hidden, hidden), 4 * hidden)
    p["fuse_b1"] = uniform(ks[9], (hidden,), 4 * hidden)
    p["fuse_w2"] = uniform(ks[10], (hidden, act_dim), hidden)
    p["fuse_b2"] = uniform(ks[11], (act_dim,), hidden)
    return p


def prepare_params(params):
    """One-time packing of all weights into a single bf16 slab (rows padded to
    multiples of 8 so every in-kernel slice is sublane-aligned) and all biases
    into one (8, hidden) f32 slab -> 2 weight DMAs instead of ~17."""
    hidden, in_ch = params["conv_w"].shape[0], params["conv_w"].shape[1]
    pose_dim = params["pose_w"].shape[0]
    goal_dim = params["goal_w"].shape[0]
    act_dim = params["act_w"].shape[0]
    K_img = _pad8(in_ch * 9)
    K_small = _pad8(max(pose_dim, goal_dim, act_dim))

    def pad_rows(w, rows):
        return jnp.pad(w, ((0, rows - w.shape[0]), (0, 0)))

    conv_w = params["conv_w"].reshape(hidden, in_ch * 9).T              # (C*9, hidden)
    fuse_w2 = jnp.pad(params["fuse_w2"], ((0, 0), (0, hidden - act_dim)))  # (hidden, hidden)

    w_slab = jnp.concatenate([
        pad_rows(conv_w, K_img),
        pad_rows(params["pose_w"], K_small),
        pad_rows(params["goal_w"], K_small),
        pad_rows(params["act_w"], K_small),
        params["fuse_w1"],                                              # (4*hidden, hidden)
        fuse_w2,                                                        # (hidden, hidden)
    ], axis=0).astype(jnp.bfloat16)

    zero = jnp.zeros((hidden,), jnp.float32)
    b_slab = jnp.stack([
        params["conv_b"], params["pose_b"], params["goal_b"], params["act_b"],
        params["fuse_b1"], jnp.pad(params["fuse_b2"], (0, hidden - act_dim)),
        zero, zero,
    ], axis=0).astype(jnp.float32)                                      # (8, hidden)
    return w_slab, b_slab


@jax.jit
def dt_forward(w_slab, b_slab, images, poses, action, goal):
    """Pallas implementation of DTModel.forward -> policy.dt(images, poses, action, goal)."""
    B, C, H, W = images.shape
    _, P, pose_dim = poses.shape
    goal_dim = goal.shape[1]
    act_dim = action.shape[1]
    hidden = b_slab.shape[1]
    HW = H * W
    K_img = _pad8(C * 9)
    K_small = _pad8(max(pose_dim, goal_dim, act_dim))

    # im2col + zero-padding to the packed weight layout (JAX glue; XLA fuses it
    # around the single Mosaic custom call).  Cast to bf16 for the MXU.
    patches = _im2col_3x3_same(images)                                  # (B*H*W, C*9)
    patches = jnp.pad(patches, ((0, 0), (0, K_img - C * 9))).astype(jnp.bfloat16)

    # pack pose / goal / action activations into one small slab (1 DMA, aligned
    # 8-row blocks, zero-padded features are inert against zero weight rows).
    s_goal = _pad8(B * P)
    s_act = s_goal + _pad8(B)
    rows = s_act + _pad8(B)
    small = jnp.zeros((rows, K_small), jnp.float32)
    small = small.at[0:B * P, 0:pose_dim].set(poses.reshape(B * P, pose_dim))
    small = small.at[s_goal:s_goal + B, 0:goal_dim].set(goal)
    small = small.at[s_act:s_act + B, 0:act_dim].set(action)
    small = small.astype(jnp.bfloat16)

    kernel = _make_dt_kernel(B=B, HW=HW, P=P, hidden=hidden, act_dim=act_dim,
                             K_img=K_img, K_small=K_small)
    vmem = pl.BlockSpec(memory_space=pltpu.MemorySpace.VMEM)
    return pl.pallas_call(
        kernel,
        out_shape=jax.ShapeDtypeStruct((B, act_dim), jnp.float32),
        in_specs=[vmem, vmem, vmem, vmem],
        out_specs=vmem,
    )(patches, small, w_slab, b_slab)


def _reference_forward(params, images, poses, action, goal):
    """Pure-JAX f32 reference of the reconstructed policy head."""
    B, C, H, W = images.shape
    hidden = params["conv_w"].shape[0]
    patches = _im2col_3x3_same(images)
    feat = jnp.maximum(patches @ params["conv_w"].reshape(hidden, C * 9).T
                       + params["conv_b"], 0.0)
    img_emb = feat.reshape(B, H * W, hidden).mean(axis=1)
    pose_feat = jnp.maximum(poses @ params["pose_w"] + params["pose_b"], 0.0)
    pose_emb = pose_feat.mean(axis=1)
    goal_emb = jnp.maximum(goal @ params["goal_w"] + params["goal_b"], 0.0)
    act_emb = jnp.maximum(action @ params["act_w"] + params["act_b"], 0.0)
    fused = jnp.concatenate([img_emb, pose_emb, goal_emb, act_emb], axis=-1)
    h = jnp.maximum(fused @ params["fuse_w1"] + params["fuse_b1"], 0.0)
    return h @ params["fuse_w2"] + params["fuse_b2"]


# ---------------------------------- main ------------------------------------ #

if __name__ == "__main__":
    key = jax.random.PRNGKey(0)
    k_img, k_pose, k_act, k_goal, k_par = jax.random.split(key, 5)

    B, C, H, W = 2, 4, 16, 16
    HIDDEN = 32
    P, POSE_DIM = 8, 3
    GOAL_DIM = 8      # number of predicates
    ACT_DIM = 6       # pick pose (3) + place pose (3)

    images = jax.random.normal(k_img, (B, C, H, W), jnp.float32)   # NCHW
    poses = jax.random.normal(k_pose, (B, P, POSE_DIM), jnp.float32)
    action = jax.random.normal(k_act, (B, ACT_DIM), jnp.float32)
    goal = jax.random.normal(k_goal, (B, GOAL_DIM), jnp.float32)

    params = init_params(k_par, in_ch=C, hidden=HIDDEN, pose_dim=POSE_DIM,
                         goal_dim=GOAL_DIM, act_dim=ACT_DIM)
    w_slab, b_slab = prepare_params(params)          # one-time layout work

    out = dt_forward(w_slab, b_slab, images, poses, action, goal)
    out = jax.block_until_ready(out)

    assert out.shape == (B, ACT_DIM) and out.dtype == jnp.float32
    assert bool(jnp.all(jnp.isfinite(out)))

    # bf16 matmul operands / f32 accumulation -> small deviation from f32 ref.
    ref = _reference_forward(params, images, poses, action, goal)
    err = float(jnp.max(jnp.abs(out - ref)))
    assert err < 5e-2, f"mismatch vs reference: max abs err = {err}"

    print("KERNEL_OK")
</pallas_src>

<mosaic_0001>
module attributes {stable_mosaic.version = 11 : i64} {
  func.func @kernel(%arg0: memref<512x40xbf16, #tpu.memory_space<vmem>>, %arg1: memref<32x8xbf16, #tpu.memory_space<vmem>>, %arg2: memref<224x32xbf16, #tpu.memory_space<vmem>>, %arg3: memref<8x32xf32, #tpu.memory_space<vmem>>, %arg4: memref<2x6xf32, #tpu.memory_space<vmem>>) attributes {dimension_semantics = [], scalar_prefetch = 0 : i64, scratch_operands = 0 : i64, tpu.core_type = #tpu.core_type<tc>} {
    %c0 = arith.constant 0 : index
    %c0_0 = arith.constant 0 : index
    %0 = vector.load %arg0[%c0, %c0_0] : memref<512x40xbf16, #tpu.memory_space<vmem>>, vector<512x40xbf16>
    %c0_1 = arith.constant 0 : index
    %c0_2 = arith.constant 0 : index
    %1 = vector.load %arg2[%c0_1, %c0_2] : memref<224x32xbf16, #tpu.memory_space<vmem>>, vector<40x32xbf16>
    %cst = arith.constant dense<0.000000e+00> : vector<512x32xf32>
    %2 = tpu.matmul %0, %1, %cst {dimension_numbers = #tpu.dot_dimension_numbers<[1], [0], [0], [1], [0, 0, 1, 1], [], []>} : vector<512x40xbf16>, vector<40x32xbf16>, vector<512x32xf32> -> vector<512x32xf32>
    %c0_3 = arith.constant 0 : index
    %c0_4 = arith.constant 0 : index
    %3 = vector.load %arg3[%c0_3, %c0_4] : memref<8x32xf32, #tpu.memory_space<vmem>>, vector<1x32xf32>
    %4 = vector.broadcast %3 : vector<1x32xf32> to vector<512x32xf32>
    %5 = arith.addf %2, %4 : vector<512x32xf32>
    %cst_5 = arith.constant 0.000000e+00 : f32
    %6 = vector.broadcast %cst_5 : f32 to vector<512x32xf32>
    %7 = arith.maximumf %5, %6 : vector<512x32xf32>
    %8 = vector.shape_cast %7 : vector<512x32xf32> to vector<2x256x32xf32>
    %cst_6 = arith.constant dense<0.000000e+00> : vector<2x32xf32>
    %9 = vector.multi_reduction <add>, %8, %cst_6 [1] : vector<2x256x32xf32> to vector<2x32xf32>
    %cst_7 = arith.constant 2.560000e+02 : f32
    %10 = vector.broadcast %cst_7 : f32 to vector<2x32xf32>
    %11 = arith.divf %9, %10 : vector<2x32xf32>
    %c0_8 = arith.constant 0 : index
    %c0_9 = arith.constant 0 : index
    %12 = vector.load %arg1[%c0_8, %c0_9] : memref<32x8xbf16, #tpu.memory_space<vmem>>, vector<16x8xbf16>
    %c40 = arith.constant 40 : index
    %c0_10 = arith.constant 0 : index
    %13 = vector.load %arg2[%c40, %c0_10] : memref<224x32xbf16, #tpu.memory_space<vmem>>, vector<8x32xbf16>
    %cst_11 = arith.constant dense<0.000000e+00> : vector<16x32xf32>
    %14 = tpu.matmul %12, %13, %cst_11 {dimension_numbers = #tpu.dot_dimension_numbers<[1], [0], [0], [1], [0, 0, 1, 1], [], []>} : vector<16x8xbf16>, vector<8x32xbf16>, vector<16x32xf32> -> vector<16x32xf32>
    %c1 = arith.constant 1 : index
    %c0_12 = arith.constant 0 : index
    %15 = vector.load %arg3[%c1, %c0_12] : memref<8x32xf32, #tpu.memory_space<vmem>>, vector<1x32xf32>
    %16 = vector.broadcast %15 : vector<1x32xf32> to vector<16x32xf32>
    %17 = arith.addf %14, %16 : vector<16x32xf32>
    %cst_13 = arith.constant 0.000000e+00 : f32
    %18 = vector.broadcast %cst_13 : f32 to vector<16x32xf32>
    %19 = arith.maximumf %17, %18 : vector<16x32xf32>
    %20 = vector.shape_cast %19 : vector<16x32xf32> to vector<2x8x32xf32>
    %cst_14 = arith.constant dense<0.000000e+00> : vector<2x32xf32>
    %21 = vector.multi_reduction <add>, %20, %cst_14 [1] : vector<2x8x32xf32> to vector<2x32xf32>
    %cst_15 = arith.constant 8.000000e+00 : f32
    %22 = vector.broadcast %cst_15 : f32 to vector<2x32xf32>
    %23 = arith.divf %21, %22 : vector<2x32xf32>
    %c16 = arith.constant 16 : index
    %c0_16 = arith.constant 0 : index
    %24 = vector.load %arg1[%c16, %c0_16] : memref<32x8xbf16, #tpu.memory_space<vmem>>, vector<2x8xbf16>
    %c48 = arith.constant 48 : index
    %c0_17 = arith.constant 0 : index
    %25 = vector.load %arg2[%c48, %c0_17] : memref<224x32xbf16, #tpu.memory_space<vmem>>, vector<8x32xbf16>
    %cst_18 = arith.constant dense<0.000000e+00> : vector<2x32xf32>
    %26 = tpu.matmul %24, %25, %cst_18 {dimension_numbers = #tpu.dot_dimension_numbers<[1], [0], [0], [1], [0, 0, 1, 1], [], []>} : vector<2x8xbf16>, vector<8x32xbf16>, vector<2x32xf32> -> vector<2x32xf32>
    %c2 = arith.constant 2 : index
    %c0_19 = arith.constant 0 : index
    %27 = vector.load %arg3[%c2, %c0_19] : memref<8x32xf32, #tpu.memory_space<vmem>>, vector<1x32xf32>
    %28 = vector.broadcast %27 : vector<1x32xf32> to vector<2x32xf32>
    %29 = arith.addf %26, %28 : vector<2x32xf32>
    %cst_20 = arith.constant 0.000000e+00 : f32
    %30 = vector.broadcast %cst_20 : f32 to vector<2x32xf32>
    %31 = arith.maximumf %29, %30 : vector<2x32xf32>
    %c24 = arith.constant 24 : index
    %c0_21 = arith.constant 0 : index
    %32 = vector.load %arg1[%c24, %c0_21] : memref<32x8xbf16, #tpu.memory_space<vmem>>, vector<2x8xbf16>
    %c56 = arith.constant 56 : index
    %c0_22 = arith.constant 0 : index
    %33 = vector.load %arg2[%c56, %c0_22] : memref<224x32xbf16, #tpu.memory_space<vmem>>, vector<8x32xbf16>
    %cst_23 = arith.constant dense<0.000000e+00> : vector<2x32xf32>
    %34 = tpu.matmul %32, %33, %cst_23 {dimension_numbers = #tpu.dot_dimension_numbers<[1], [0], [0], [1], [0, 0, 1, 1], [], []>} : vector<2x8xbf16>, vector<8x32xbf16>, vector<2x32xf32> -> vector<2x32xf32>
    %c3 = arith.constant 3 : index
    %c0_24 = arith.constant 0 : index
    %35 = vector.load %arg3[%c3, %c0_24] : memref<8x32xf32, #tpu.memory_space<vmem>>, vector<1x32xf32>
    %36 = vector.broadcast %35 : vector<1x32xf32> to vector<2x32xf32>
    %37 = arith.addf %34, %36 : vector<2x32xf32>
    %cst_25 = arith.constant 0.000000e+00 : f32
    %38 = vector.broadcast %cst_25 : f32 to vector<2x32xf32>
    %39 = arith.maximumf %37, %38 : vector<2x32xf32>
    %40 = tpu.concatenate %11, %23, %31, %39 in 1 : vector<2x32xf32>, vector<2x32xf32>, vector<2x32xf32>, vector<2x32xf32> -> vector<2x128xf32>
    %41 = arith.truncf %40 : vector<2x128xf32> to vector<2x128xbf16>
    %c64 = arith.constant 64 : index
    %c0_26 = arith.constant 0 : index
    %42 = vector.load %arg2[%c64, %c0_26] : memref<224x32xbf16, #tpu.memory_space<vmem>>, vector<128x32xbf16>
    %cst_27 = arith.constant dense<0.000000e+00> : vector<2x32xf32>
    %43 = tpu.matmul %41, %42, %cst_27 {dimension_numbers = #tpu.dot_dimension_numbers<[1], [0], [0], [1], [0, 0, 1, 1], [], []>} : vector<2x128xbf16>, vector<128x32xbf16>, vector<2x32xf32> -> vector<2x32xf32>
    %c4 = arith.constant 4 : index
    %c0_28 = arith.constant 0 : index
    %44 = vector.load %arg3[%c4, %c0_28] : memref<8x32xf32, #tpu.memory_space<vmem>>, vector<1x32xf32>
    %45 = vector.broadcast %44 : vector<1x32xf32> to vector<2x32xf32>
    %46 = arith.addf %43, %45 : vector<2x32xf32>
    %cst_29 = arith.constant 0.000000e+00 : f32
    %47 = vector.broadcast %cst_29 : f32 to vector<2x32xf32>
    %48 = arith.maximumf %46, %47 : vector<2x32xf32>
    %49 = arith.truncf %48 : vector<2x32xf32> to vector<2x32xbf16>
    %c192 = arith.constant 192 : index
    %c0_30 = arith.constant 0 : index
    %50 = vector.load %arg2[%c192, %c0_30] : memref<224x32xbf16, #tpu.memory_space<vmem>>, vector<32x32xbf16>
    %cst_31 = arith.constant dense<0.000000e+00> : vector<2x32xf32>
    %51 = tpu.matmul %49, %50, %cst_31 {dimension_numbers = #tpu.dot_dimension_numbers<[1], [0], [0], [1], [0, 0, 1, 1], [], []>} : vector<2x32xbf16>, vector<32x32xbf16>, vector<2x32xf32> -> vector<2x32xf32>
    %c5 = arith.constant 5 : index
    %c0_32 = arith.constant 0 : index
    %52 = vector.load %arg3[%c5, %c0_32] : memref<8x32xf32, #tpu.memory_space<vmem>>, vector<1x32xf32>
    %53 = vector.broadcast %52 : vector<1x32xf32> to vector<2x32xf32>
    %54 = arith.addf %51, %53 : vector<2x32xf32>
    %55 = vector.extract_strided_slice %54 {offsets = [0, 0], sizes = [2, 6], strides = [1, 1]} : vector<2x32xf32> to vector<2x6xf32>
    %c0_33 = arith.constant 0 : index
    %c0_34 = arith.constant 0 : index
    %56 = vector.load %arg4[%c0_33, %c0_34] : memref<2x6xf32, #tpu.memory_space<vmem>>, vector<2x6xf32>
    tpu.vector_store %arg4[%c0_33, %c0_34], %55 {strides = array<i32>} : memref<2x6xf32, #tpu.memory_space<vmem>>, vector<2x6xf32>,
    return
  }
}

</mosaic_0001>

<bundles_post_ra>
// kernel: dt_forward.1
= control target key start
LH: loop header
LB: loop body
LE: loop exit
PB: predicated region body
PF: predicated region fallthrough
CT: control target
= control target key end

     0   :  { %vm365_vm0 = vcmask 1043456   ;;  %vm268_vm1 = vcmask 326656   ;;  %v1607_v10 = vmov 0.0   ;;  %vm877_vm2 = vcmask 64512   ;;  %s2067_s0 = inlined_call_operand.vmem [shape: bf16[512,40], index: 0, kind: input, shape index: {}]   ;;  %s2068_s1 = inlined_call_operand.vmem [shape: bf16[32,8], index: 1, kind: input, shape index: {}]   ;;  %s2069_s2 = inlined_call_operand.vmem [shape: bf16[224,32], index: 2, kind: input, shape index: {}]   ;;  %s2070_s3 = inlined_call_operand.vmem [shape: f32[8,32], index: 3, kind: input, shape index: {}]   ;;  %s2071_s4 = inlined_call_operand.hbm [shape: f32[2,6], index: 4, kind: output, shape index: {}]  }
   0x1   :  { %v1539_v0 = vld [vmem:[%s2069_s2 + $0x10] ss:$0 sps:$4 sm:$0xff]   ;;  %v1540_v1 = vld [vmem:[%s2069_s2 + $0x8] sm:$0xff]   ;;  %v1541_v3 = vld [vmem:[%s2069_s2] sm:$0xff]   ;;  %vm1608_vm3 = vmmov 0  }
   0x2   :  { %1531 = vmatprep.subr.msk.bf16.mxu0 %vm365_vm0, %v1539_v0  ;;  %1532 = vmatprep.subr.msk.bf16.mxu1 %vm365_vm0, %v1539_v0  ;;  %v367_v2 = vsel %vm365_vm0, %v1539_v0, 0  ;;  %v1542_v4 = vld [vmem:[%s2067_s0] sm:$0xff]   ;;  %v1544_v6 = vld [vmem:[%s2067_s0 + $0x8] sm:$0xff]   ;;  %v866_v7 = vld [vmem:[%s2069_s2 + $0x14] sm:$0xf] }
   0x3   :  { %1410 = vmatpush3.bf16.msra.mxu0 %v367_v2  ;;  %1528 = vmatpush3.bf16.msra.mxu1 %v367_v2  ;;  %v1543_v5 = vld [vmem:[%s2067_s0 + $0xc0] sm:$0xff]   ;;  %v1545_v8 = vld [vmem:[%s2067_s0 + $0xc8] sm:$0xff]   ;;  %v1546_v9 = vld [vmem:[%s2067_s0 + $0x10] sm:$0xff]   ;;  %v882_v11 = vsel %vm365_vm0, %v866_v7, 0 }
   0x4   :  { %1411 = vmatprep.subr.bf16.mxu0 %v1540_v1  ;;  %1526 = vmatprep.subr.bf16.mxu1 %v1540_v1  ;;  %v1547_v12 = vld [vmem:[%s2067_s0 + $0xd0] sm:$0xff]   ;;  %v1548_v13 = vld [vmem:[%s2067_s0 + $0x18] sm:$0xff]   ;;  %v1550_v15 = vld [vmem:[%s2067_s0 + $0x20] sm:$0xff]  }
   0x5   :  { %1415 = vmatprep.mubr.msk.bf16.mxu0 %vm268_vm1, %v1542_v4  ;;  %1463 = vmatprep.mubr.msk.bf16.mxu1 %vm268_vm1, %v1543_v5  ;;  %v1549_v14 = vld [vmem:[%s2067_s0 + $0xd8] sm:$0xff]   ;;  %v1551_v16 = vld [vmem:[%s2067_s0 + $0xe0] sm:$0xff]   ;;  %v1552_v17 = vld [vmem:[%s2067_s0 + $0x28] sm:$0xff]  }
   0x6   :  { %v1553_v18 = vld [vmem:[%s2067_s0 + $0xe8] sm:$0xff]   ;;  %v1554_v19 = vld [vmem:[%s2067_s0 + $0x30] sm:$0xff]   ;;  %v1556_v21 = vld [vmem:[%s2067_s0 + $0x38] sm:$0xff]  }
   0x7   :  { %1412 = vmatpush3.bf16.msra.mxu0 %v1540_v1  ;;  %1529 = vmatpush3.bf16.msra.mxu1 %v1540_v1  ;;  %v1555_v20 = vld [vmem:[%s2067_s0 + $0xf0] sm:$0xff]   ;;  %v1557_v22 = vld [vmem:[%s2067_s0 + $0xf8] sm:$0xff]   ;;  %v1558_v23 = vld [vmem:[%s2067_s0 + $0x40] sm:$0xff]  }
   0x8   :  { %1413 = vmatprep.subr.bf16.mxu0 %v1541_v3  ;;  %1527 = vmatprep.subr.bf16.mxu1 %v1541_v3  ;;  %v945_v24 = vld [vmem:[%s2069_s2 + $0x18] sm:$0xf]  ;;  %v1559_v25 = vld [vmem:[%s2067_s0 + $0x48] sm:$0xff]   ;;  %v1560_v26 = vld [vmem:[%s2068_s1] sm:$0xff]  }
   0x9   :  { %v1561_v27 = vld [vmem:[%s2067_s0 + $0x50] sm:$0xff]   ;;  %v955_v28 = vsel %vm365_vm0, %v945_v24, 0 }
   0xb   :  { %1414 = vmatpush3.bf16.msra.mxu0 %v1541_v3  ;;  %1530 = vmatpush3.bf16.msra.mxu1 %v1541_v3 }
   0xc   :  { %1479 = vmatprep.subr.bf16.mxu1 %v1607_v10 }
   0xe   :  { %1416 = vmatmul.mubr.msk.bf16.vlgmr.msra.gmra.mxu0 %vm268_vm1, %v1544_v6  ;;  %1464 = vmatmul.mubr.msk.bf16.vlgmr.msra.gmra.mxu1 %vm268_vm1, %v1545_v8 }
   0xf   :  { %1480 = vmatpush3.bf16.msra.mxu1 %v882_v11  ;;  %1419 = vmatprep.mubr.msk.bf16.mxu0 %vm268_vm1, %v1546_v9 }
  0x10   :  { %1467 = vmatprep.mubr.msk.bf16.mxu1 %vm268_vm1, %v1547_v12  ;;  %1485 = vmatprep.subr.bf16.mxu1 %v1607_v10 }
  0x16   :  { %1420 = vmatmul.mubr.msk.bf16.gmra.mxu0 %vm268_vm1, %v1548_v13  ;;  %1468 = vmatmul.mubr.msk.bf16.gmra.mxu1 %vm268_vm1, %v1549_v14 }
  0x17   :  { %1423 = vmatprep.mubr.msk.bf16.mxu0 %vm268_vm1, %v1550_v15  ;;  %1471 = vmatprep.mubr.msk.bf16.mxu1 %vm268_vm1, %v1551_v16 }
  0x1e   :  { %1424 = vmatmul.mubr.msk.bf16.gmra.mxu0 %vm268_vm1, %v1552_v17  ;;  %1472 = vmatmul.mubr.msk.bf16.gmra.mxu1 %vm268_vm1, %v1553_v18 }
  0x1f   :  { %1427 = vmatprep.mubr.msk.bf16.mxu0 %vm268_vm1, %v1554_v19  ;;  %1475 = vmatprep.mubr.msk.bf16.mxu1 %vm268_vm1, %v1555_v20 }
  0x26   :  { %1428 = vmatmul.mubr.msk.bf16.gmra.mxu0 %vm268_vm1, %v1556_v21  ;;  %1476 = vmatmul.mubr.msk.bf16.gmra.mxu1 %vm268_vm1, %v1557_v22 }
  0x27   :  { %1431 = vmatprep.mubr.msk.bf16.mxu0 %vm268_vm1, %v1558_v23  ;;  %1481 = vmatprep.mubr.msk.bf16.mxu1 %vm1608_vm3, %v1607_v10 }
  0x28   :  { %9 = vsyncpa [#allocation3], 0  ;;  %v999_v29 = vld [vmem:[%s2069_s2 + $0x1c] sm:$0xf]  ;;  %v944_v31 = vld [vmem:[%s2068_s1 + $0x8] sm:$0x1] }
  0x29   :  { %v1562_v30 = vld [vmem:[%s2067_s0 + $0x58] sm:$0xff]   ;;  %v1563_v32 = vld [vmem:[%s2067_s0 + $0x60] sm:$0xff]   ;;  %v1009_v33 = vsel %vm365_vm0, %v999_v29, 0  ;;  %v1564_v34 = vld [vmem:[%s2067_s0 + $0x68] sm:$0xff]   ;;  %vm722_vm4 = vcmask 261120   ;;  %vm1054_vm5 = vcmask 1041409  }
  0x2a   :  { %v998_v35 = vld [vmem:[%s2068_s1 + $0xc] sm:$0x1]  ;;  %v1565_v36 = vld [vmem:[%s2067_s0 + $0x70] sm:$0xff]   ;;  %v1566_v37 = vld [vmem:[%s2067_s0 + $0x78] sm:$0xff]   ;;  %s1609_s14 = smov 96   ;;  %s1610_s15 = smov 32  }
  0x2b   :  { %v1567_v38 = vld [vmem:[%s2067_s0 + $0x80] sm:$0xff]   ;;  %v1568_v39 = vld [vmem:[%s2067_s0 + $0x88] sm:$0xff]   ;;  %v1569_v40 = vld [vmem:[%s2067_s0 + $0x90] sm:$0xff]   ;;  %s1611_s16 = smov 64   ;;  %vm1072_vm6 = vcmask 523264   ;;  %vm1074_vm7 = vcmask 785408  }
  0x2c   :  { %v1570_v41 = vld [vmem:[%s2067_s0 + $0x98] sm:$0xff]   ;;  %v1571_v42 = vld [vmem:[%s2067_s0 + $0xa0] sm:$0xff]   ;;  %v1572_v43 = vld [vmem:[%s2067_s0 + $0xa8] sm:$0xff]   ;;  %s1612_s24 = smov [#allocation2]   ;;  %vm1252_vm8 = vcmask 41984  }
  0x2d   :  { %v1573_v44 = vld [vmem:[%s2067_s0 + $0xb0] sm:$0xff]   ;;  %v1574_v45 = vld [vmem:[%s2067_s0 + $0xb8] sm:$0xff]   ;;  %v1577_v50 = vld [vmem:[%s2069_s2 + $0x48] sm:$0xff]  }
  0x2e   :  { %1432 = vmatmul.mubr.msk.bf16.gmra.mxu0 %vm268_vm1, %v1559_v25  ;;  %1482 = vmatmul.mubr.msk.bf16.vlgmr.msra.gmra.mxu1 %vm877_vm2, %v1560_v26  ;;  %v1575_v46 = vld [vmem:[%s2069_s2 + $0x58] sm:$0xff]   ;;  %v1576_v47 = vld [vmem:[%s2069_s2 + $0x50] sm:$0xff]   ;;  %v1830_v51 = vld [vmem:[%s2070_s3] ss:$0 sm:$0xff] }
  0x2f   :  { %1435 = vmatprep.mubr.msk.bf16.mxu0 %vm268_vm1, %v1561_v27  ;;  %1486 = vmatpush3.bf16.msra.mxu1 %v955_v28  ;;  %v1578_v58 = vld [vmem:[%s2069_s2 + $0x40] sm:$0xff]   ;;  %v1579_v3 = vld [vmem:[%s2069_s2 + $0x38] sm:$0xff]   ;;  %v1580_v17 = vld [vmem:[%s2069_s2 + $0x30] sm:$0xff]  }
  0x30   :  { %1487 = vmatprep.mubr.msk.bf16.mxu1 %vm1608_vm3, %v1607_v10  ;;  %1491 = vmatprep.subr.bf16.mxu1 %v1607_v10 }
  0x36   :  { %1436 = vmatmul.mubr.msk.bf16.gmra.mxu0 %vm268_vm1, %v1562_v30  ;;  %1488 = vmatmul.mubr.msk.bf16.vlgmr.msra.gmra.mxu1 %vm877_vm2, %v944_v31 }
  0x37   :  { %1439 = vmatprep.mubr.msk.bf16.mxu0 %vm268_vm1, %v1563_v32  ;;  %1492 = vmatpush3.bf16.msra.mxu1 %v1009_v33 }
  0x38   :  { %1493 = vmatprep.mubr.msk.bf16.mxu1 %vm1608_vm3, %v1607_v10  ;;  %1497 = vmatprep.subr.bf16.mxu1 %v1607_v10 }
  0x3e   :  { %1440 = vmatmul.mubr.msk.bf16.gmra.mxu0 %vm268_vm1, %v1564_v34  ;;  %1494 = vmatmul.mubr.msk.bf16.vlgmr.msra.gmra.mxu1 %vm877_vm2, %v998_v35 }
  0x3f   :  { %1443 = vmatprep.mubr.msk.bf16.mxu0 %vm268_vm1, %v1565_v36  ;;  %1513 = vmatprep.mubr.msk.bf16.mxu1 %vm1608_vm3, %v1607_v10 }
  0x40   :  { %1498 = vmatpush3.bf16.msra.mxu1 %v1575_v46 }
  0x41   :  { %1499 = vmatprep.subr.bf16.mxu1 %v1607_v10 }
  0x44   :  { %1500 = vmatpush3.bf16.msra.mxu1 %v1576_v47 }
  0x45   :  { %1501 = vmatprep.subr.bf16.mxu1 %v1607_v10 }
  0x46   :  { %1444 = vmatmul.mubr.msk.bf16.gmra.mxu0 %vm268_vm1, %v1566_v37 }
  0x47   :  { %1447 = vmatprep.mubr.msk.bf16.mxu0 %vm268_vm1, %v1567_v38 }
  0x48   :  { %1502 = vmatpush3.bf16.msra.mxu1 %v1577_v50 }
  0x49   :  { %1503 = vmatprep.subr.bf16.mxu1 %v1607_v10 }
  0x4c   :  { %1504 = vmatpush3.bf16.msra.mxu1 %v1578_v58 }
  0x4d   :  { %1505 = vmatprep.subr.bf16.mxu1 %v1607_v10 }
  0x4e   :  { %1448 = vmatmul.mubr.msk.bf16.gmra.mxu0 %vm268_vm1, %v1568_v39 }
  0x4f   :  { %1451 = vmatprep.mubr.msk.bf16.mxu0 %vm268_vm1, %v1569_v40 }
  0x50   :  { %1506 = vmatpush3.bf16.msra.mxu1 %v1579_v3 }
  0x51   :  { %1507 = vmatprep.subr.bf16.mxu1 %v1607_v10 }
  0x54   :  { %1508 = vmatpush3.bf16.msra.mxu1 %v1580_v17 }
  0x55   :  { %1509 = vmatprep.subr.bf16.mxu1 %v1607_v10 }
  0x56   :  { %1452 = vmatmul.mubr.msk.bf16.gmra.mxu0 %vm268_vm1, %v1570_v41 }
  0x57   :  { %1455 = vmatprep.mubr.msk.bf16.mxu0 %vm268_vm1, %v1571_v42 }
  0x5e   :  { %1456 = vmatmul.mubr.msk.bf16.gmra.mxu0 %vm268_vm1, %v1572_v43 }
  0x5f   :  { %1459 = vmatprep.mubr.msk.bf16.mxu0 %vm268_vm1, %v1573_v44 }
  0x66   :  { %1460 = vmatmul.mubr.msk.bf16.gmra.mxu0 %vm268_vm1, %v1574_v45 }
  0xce   :  { %v1417_v48 = vpop.f32.mrf.mxu0  ;;  %v1821_v49 = vpop.f32.mrf.mxu1 }
  0xcf   :  { %v412_v54 = vadd.f32 %v1417_v48, %v1830_v51 }
  0xd0   :  { %v403_v52 = vpop.f32.mrf.mxu0  ;;  %v1832_v53 = vpop.f32.mrf.mxu1 }
  0xd1   :  { %v404_v55 = vadd.f32 %v1830_v51, %v403_v52  ;;  %v660_v63 = vmax.f32 %v412_v54, 0.0 }
  0xd2   :  { %v1418_v56 = vpop.f32.mrf.mxu0  ;;  %v1836_v57 = vpop.f32.mrf.mxu1 }
  0xd3   :  { %v658_v59 = vmax.f32 %v404_v55, 0.0  ;;  %v415_v60 = vadd.f32 %v1418_v56, %v1830_v51  ;;  %v726_v9 = vsel %vm722_vm4, %v660_v63, 0.0 }
  0xd4   :  { %v406_v61 = vpop.f32.mrf.mxu0  ;;  %v1843_v62 = vpop.f32.mrf.mxu1 }
  0xd5   :  { %v407_v0 = vadd.f32 %v1830_v51, %v406_v61  ;;  %v723_v4 = vsel %vm722_vm4, %v658_v59, 0.0  ;;  %v661_v5 = vmax.f32 %v415_v60, 0.0 }
  0xd6   :  { %v1421_v1 = vpop.f32.mrf.mxu0  ;;  %v1846_v2 = vpop.f32.mrf.mxu1 }
  0xd7   :  { %v659_v6 = vmax.f32 %v407_v0, 0.0  ;;  %v428_v12 = vadd.f32 %v1421_v1, %v1830_v51  ;;  %v728_v18 = vsel %vm722_vm4, %v661_v5, 0.0 }
  0xd8   :  { %v419_v7 = vpop.f32.mrf.mxu0  ;;  %v1853_v8 = vpop.f32.mrf.mxu1 }
  0xd9   :  { %v724_v11 = vsel %vm722_vm4, %v659_v6, 0.0  ;;  %v420_v14 = vadd.f32 %v1830_v51, %v419_v7  ;;  %v664_v24 = vmax.f32 %v428_v12, 0.0 }
  0xda   :  { %v725_v13 = vadd.f32 %v724_v11, %v723_v4  ;;  %v1422_v15 = vpop.f32.mrf.mxu0  ;;  %v1859_v16 = vpop.f32.mrf.mxu1 }
  0xdb   :  { %v431_v19 = vadd.f32 %v1422_v15, %v1830_v51  ;;  %v662_v21 = vmax.f32 %v420_v14, 0.0  ;;  %v734_v35 = vsel %vm722_vm4, %v664_v24, 0.0 }
  0xdc   :  { %v727_v20 = vadd.f32 %v726_v9, %v725_v13  ;;  %v422_v22 = vpop.f32.mrf.mxu0  ;;  %v1867_v23 = vpop.f32.mrf.mxu1 }
  0xdd   :  { %v423_v25 = vadd.f32 %v1830_v51, %v422_v22  ;;  %v730_v27 = vsel %vm722_vm4, %v662_v21, 0.0  ;;  %v665_v30 = vmax.f32 %v431_v19, 0.0 }
  0xde   :  { %v729_v26 = vadd.f32 %v728_v18, %v727_v20  ;;  %v1425_v28 = vpop.f32.mrf.mxu0  ;;  %v1871_v29 = vpop.f32.mrf.mxu1  ;;  %v1336_v18 = vld [vmem:[%s2070_s3 + $0x1] ss:$0 sm:$0xff] }
  0xdf   :  { %v663_v31 = vmax.f32 %v423_v25, 0.0  ;;  %v444_v39 = vadd.f32 %v1425_v28, %v1830_v51  ;;  %v736_v42 = vsel %vm722_vm4, %v665_v30, 0.0 }
  0xe0   :  { %v731_v32 = vadd.f32 %v730_v27, %v729_v26  ;;  %v435_v33 = vpop.f32.mrf.mxu0  ;;  %v1874_v34 = vpop.f32.mrf.mxu1 }
  0xe1   :  { %v732_v36 = vsel %vm722_vm4, %v663_v31, 0.0  ;;  %v436_v37 = vadd.f32 %v1830_v51, %v435_v33  ;;  %v668_v50 = vmax.f32 %v444_v39, 0.0 }
  0xe2   :  { %v733_v38 = vadd.f32 %v732_v36, %v731_v32  ;;  %v1426_v40 = vpop.f32.mrf.mxu0  ;;  %v1880_v41 = vpop.f32.mrf.mxu1 }
  0xe3   :  { %v666_v43 = vmax.f32 %v436_v37, 0.0  ;;  %v447_v45 = vadd.f32 %v1426_v40, %v1830_v51  ;;  %v742_v1 = vsel %vm722_vm4, %v668_v50, 0.0 }
  0xe4   :  { %v735_v44 = vadd.f32 %v734_v35, %v733_v38  ;;  %v438_v46 = vpop.f32.mrf.mxu0  ;;  %v1884_v47 = vpop.f32.mrf.mxu1 }
  0xe5   :  { %v738_v48 = vsel %vm722_vm4, %v666_v43, 0.0  ;;  %v439_v54 = vadd.f32 %v1830_v51, %v438_v46  ;;  %v669_v59 = vmax.f32 %v447_v45, 0.0 }
  0xe6   :  { %v737_v52 = vadd.f32 %v736_v42, %v735_v44  ;;  %v1429_v55 = vpop.f32.mrf.mxu0  ;;  %v1888_v56 = vpop.f32.mrf.mxu1 }
  0xe7   :  { %v667_v60 = vmax.f32 %v439_v54, 0.0  ;;  %v460_v4 = vadd.f32 %v1429_v55, %v1830_v51  ;;  %v744_v11 = vsel %vm722_vm4, %v669_v59, 0.0 }
  0xe8   :  { %v739_v58 = vadd.f32 %v738_v48, %v737_v52  ;;  %v451_v61 = vpop.f32.mrf.mxu0  ;;  %v1890_v63 = vpop.f32.mrf.mxu1 }
  0xe9   :  { %v452_v0 = vadd.f32 %v1830_v51, %v451_v61  ;;  %v740_v3 = vsel %vm722_vm4, %v667_v60, 0.0  ;;  %v672_v19 = vmax.f32 %v460_v4, 0.0 }
  0xea   :  { %v1430_v5 = vpop.f32.mrf.mxu0  ;;  %v1896_v6 = vpop.f32.mrf.mxu1  ;;  %v741_v7 = vadd.f32 %v740_v3, %v739_v58 }
  0xeb   :  { %v670_v9 = vmax.f32 %v452_v0, 0.0  ;;  %v463_v12 = vadd.f32 %v1430_v5, %v1830_v51  ;;  %v750_v33 = vsel %vm722_vm4, %v672_v19, 0.0 }
  0xec   :  { %v454_v13 = vpop.f32.mrf.mxu0  ;;  %v1900_v14 = vpop.f32.mrf.mxu1  ;;  %v743_v15 = vadd.f32 %v742_v1, %v741_v7 }
  0xed   :  { %v455_v17 = vadd.f32 %v1830_v51, %v454_v13  ;;  %v746_v20 = vsel %vm722_vm4, %v670_v9, 0.0  ;;  %v673_v26 = vmax.f32 %v463_v12, 0.0 }
  0xee   :  { %v1433_v21 = vpop.f32.mrf.mxu0  ;;  %v918_v22 = vpop.f32.mrf.mxu1  ;;  %v745_v24 = vadd.f32 %v744_v11, %v743_v15 }
  0xef   :  { %v671_v25 = vmax.f32 %v455_v17, 0.0  ;;  %v919_v27 = vadd.f32 %v1336_v18, %v918_v22  ;;  %v476_v35 = vadd.f32 %v1433_v21, %v1830_v51  ;;  %v752_v43 = vsel %vm722_vm4, %v673_v26, 0.0 }
  0xf0   :  { %v467_v28 = vpop.f32.mrf.mxu0  ;;  %v1483_v30 = vpop.f32.mrf.mxu1  ;;  %v747_v31 = vadd.f32 %v746_v20, %v745_v24 }
  0xf1   :  { %v748_v32 = vsel %vm722_vm4, %v671_v25, 0.0  ;;  %v925_v36 = vmax.f32 %v919_v27, 0.0  ;;  %v468_v37 = vadd.f32 %v1830_v51, %v467_v28  ;;  %v676_v58 = vmax.f32 %v476_v35, 0.0  ;;  %v1581_v25 = vld [vmem:[%s2069_s2 + $0x28] sm:$0xff]  }
  0xf2   :  { %v1434_v38 = vpop.f32.mrf.mxu0  ;;  %v921_v39 = vpop.f32.mrf.mxu1  ;;  %v749_v40 = vadd.f32 %v748_v32, %v747_v31  ;;  %1510 = vmatpush3.bf16.msra.mxu1 %v1581_v25 }
  0xf3   :  { %v922_v42 = vadd.f32 %v1336_v18, %v921_v39  ;;  %v927_v44 = vsel %vm722_vm4, %v925_v36, 0.0  ;;  %v674_v45 = vmax.f32 %v468_v37, 0.0  ;;  %v479_v46 = vadd.f32 %v1434_v38, %v1830_v51  ;;  %v1341_v38 = vld [vmem:[%s2070_s3 + $0x3] ss:$0 sm:$0xff]  ;;  %1511 = vmatprep.subr.bf16.mxu1 %v1607_v10 }
  0xf4   :  { %v470_v48 = vpop.f32.mrf.mxu0  ;;  %v1484_v50 = vpop.f32.mrf.mxu1  ;;  %v751_v52 = vadd.f32 %v750_v33, %v749_v40  ;;  %v928_v54 = vrot.slane %v927_v44, 4  ;;  %v758_v18 = vsel %vm722_vm4, %v676_v58, 0.0 }
  0xf5   :  { %v926_v55 = vmax.f32 %v922_v42, 0.0  ;;  %v754_v59 = vsel %vm722_vm4, %v674_v45, 0.0  ;;  %v471_v60 = vadd.f32 %v1830_v51, %v470_v48  ;;  %v677_v5 = vmax.f32 %v479_v46, 0.0  ;;  %v1582_v50 = vld [vmem:[%s2069_s2 + $0x20] sm:$0xff]  }
  0xf6   :  { %v1437_v61 = vpop.f32.mrf.mxu0  ;;  %v1916_v0 = vpop.f32.mrf.mxu1  ;;  %v929_v1 = vadd.f32 %v928_v54, %v927_v44  ;;  %v753_v3 = vadd.f32 %v752_v43, %v751_v52  ;;  %1512 = vmatpush3.bf16.msra.mxu1 %v1582_v50 }
  0xf7   :  { %v934_v4 = vsel %vm722_vm4, %v926_v55, 0.0  ;;  %v675_v9 = vmax.f32 %v471_v60, 0.0  ;;  %v492_v21 = vadd.f32 %v1437_v61, %v1830_v51  ;;  %v760_v30 = vsel %vm722_vm4, %v677_v5, 0.0  ;;  %v1339_v5 = vld [vmem:[%s2070_s3 + $0x2] ss:$0 sm:$0xff]  ;;  %1517 = vmatprep.subr.bf16.mxu1 %v1607_v10 }
  0xf8   :  { %v935_v7 = vrot.slane %v934_v4, 4  ;;  %v483_v11 = vpop.f32.mrf.mxu0  ;;  %v1489_v12 = vpop.f32.mrf.mxu1  ;;  %v930_v13 = vrot.slane %v929_v1, 2  ;;  %v755_v15 = vadd.f32 %v754_v59, %v753_v3  ;;  %v992_v25 = vadd.f32 %v1339_v5, %v1916_v0 }
  0xf9   :  { %v484_v17 = vadd.f32 %v1830_v51, %v483_v11  ;;  %v756_v20 = vsel %vm722_vm4, %v675_v9, 0.0  ;;  %v680_v40 = vmax.f32 %v492_v21, 0.0 }
  0xfa   :  { %v936_v19 = vadd.f32 %v935_v7, %v934_v4  ;;  %v1438_v22 = vpop.f32.mrf.mxu0  ;;  %v994_v24 = vpop.f32.mrf.mxu1  ;;  %v931_v26 = vadd.f32 %v930_v13, %v929_v1  ;;  %v757_v27 = vadd.f32 %v756_v20, %v755_v15 }
  0xfb   :  { %v678_v28 = vmax.f32 %v484_v17, 0.0  ;;  %v495_v32 = vadd.f32 %v1438_v22, %v1830_v51  ;;  %v766_v4 = vsel %vm722_vm4, %v680_v40, 0.0 }
  0xfc   :  { %v937_v31 = vrot.slane %v936_v19, 2  ;;  %v486_v33 = vpop.f32.mrf.mxu0  ;;  %v1490_v35 = vpop.f32.mrf.mxu1  ;;  %v759_v36 = vadd.f32 %v758_v18, %v757_v27  ;;  %v932_v45 = vrot.slane %v931_v26, 1 }
  0xfd   :  { %v487_v37 = vadd.f32 %v1830_v51, %v486_v33  ;;  %v762_v42 = vsel %vm722_vm4, %v678_v28, 0.0  ;;  %v681_v52 = vmax.f32 %v495_v32, 0.0 }
  0xfe   :  { %v938_v39 = vadd.f32 %v937_v31, %v936_v19  ;;  %v1441_v43 = vpop.f32.mrf.mxu0  ;;  %v1045_v44 = vpop.f32.mrf.mxu1  ;;  %v761_v46 = vadd.f32 %v760_v30, %v759_v36  ;;  %v933_v59 = vadd.f32 %v932_v45, %v931_v26 }
  0xff   :  { %v679_v48 = vmax.f32 %v487_v37, 0.0  ;;  %v1046_v55 = vadd.f32 %v1341_v38, %v1045_v44  ;;  %v508_v7 = vadd.f32 %v1441_v43, %v1830_v51  ;;  %v768_v18 = vsel %vm722_vm4, %v681_v52, 0.0 }
 0x100   :  { %v499_v54 = vpop.f32.mrf.mxu0  ;;  %v1495_v58 = vpop.f32.mrf.mxu1  ;;  %v939_v60 = vrot.slane %v938_v39, 1  ;;  %v763_v61 = vadd.f32 %v762_v42, %v761_v46  ;;  %v942_v21 = vmul.f32 0.125, %v933_v59  ;;  %v997_v38 = vmax.f32 %v992_v25, 0.0 }
 0x101   :  { %v764_v1 = vsel %vm722_vm4, %v679_v48, 0.0  ;;  %v500_v3 = vadd.f32 %v1830_v51, %v499_v54  ;;  %v1051_v11 = vmax.f32 %v1046_v55, 0.0  ;;  %v684_v28 = vmax.f32 %v508_v7, 0.0 }
 0x102   :  { %v1442_v9 = vpop.f32.mrf.mxu0  ;;  %v1048_v12 = vpop.f32.mrf.mxu1  ;;  %v940_v13 = vadd.f32 %v939_v60, %v938_v39  ;;  %v765_v15 = vadd.f32 %v764_v1, %v763_v61 }
 0x103   :  { %v682_v17 = vmax.f32 %v500_v3, 0.0  ;;  %v511_v19 = vadd.f32 %v1442_v9, %v1830_v51  ;;  %1068 = vrot.lane.b32.xlu1 %v1051_v11, %s1609_s14  ;;  %v774_v42 = vsel %vm722_vm4, %v684_v28, 0.0 }
 0x104   :  { %v502_v20 = vpop.f32.mrf.mxu0  ;;  %v943_v22 = vmul.f32 0.125, %v940_v13  ;;  %v1496_v24 = vpop.f32.mrf.mxu1  ;;  %v767_v26 = vadd.f32 %v766_v4, %v765_v15 }
 0x105   :  { %v503_v27 = vadd.f32 %v1830_v51, %v502_v20  ;;  %v770_v30 = vsel %vm722_vm4, %v682_v17, 0.0  ;;  %v685_v36 = vmax.f32 %v511_v19, 0.0 }
 0x106   :  { %v1445_v31 = vpop.f32.mrf.mxu0  ;;  %v1059_v32 = vsel %vm1054_vm5, %v943_v22, %v942_v21  ;;  %v769_v33 = vadd.f32 %v768_v18, %v767_v26 }
 0x107   :  { %v683_v35 = vmax.f32 %v503_v27, 0.0  ;;  %1060 = vrot.lane.b32.xlu0 %v1059_v32, %s1610_s15  ;;  %v524_v43 = vadd.f32 %v1445_v31, %v1830_v51  ;;  %v776_v48 = vsel %vm722_vm4, %v685_v36, 0.0 }
 0x108   :  { %v515_v37 = vpop.f32.mrf.mxu0  ;;  %v771_v39 = vadd.f32 %v770_v30, %v769_v33 }
 0x109   :  { %v772_v40 = vsel %vm722_vm4, %v683_v35, 0.0  ;;  %v516_v0 = vadd.f32 %v1830_v51, %v515_v37  ;;  %v688_v58 = vmax.f32 %v524_v43, 0.0 }
 0x10a   :  { %v1446_v44 = vpop.f32.mrf.mxu0  ;;  %v773_v45 = vadd.f32 %v772_v40, %v771_v39 }
 0x10b   :  { %v686_v46 = vmax.f32 %v516_v0, 0.0  ;;  %1064 = vrot.lane.b32.xlu0 %v997_v38, %s1611_s16  ;;  %v527_v50 = vadd.f32 %v1446_v44, %v1830_v51  ;;  %v782_v12 = vsel %vm722_vm4, %v688_v58, 0.0 }
 0x10c   :  { %v518_v52 = vpop.f32.mrf.mxu0  ;;  %v775_v54 = vadd.f32 %v774_v42, %v773_v45 }
 0x10d   :  { %v519_v55 = vadd.f32 %v1830_v51, %v518_v52  ;;  %v778_v59 = vsel %vm722_vm4, %v686_v46, 0.0  ;;  %v689_v3 = vmax.f32 %v527_v50, 0.0 }
 0x10e   :  { %v1449_v60 = vpop.f32.mrf.mxu0  ;;  %v777_v61 = vadd.f32 %v776_v48, %v775_v54 }
 0x10f   :  { %v687_v1 = vmax.f32 %v519_v55, 0.0  ;;  %v540_v9 = vadd.f32 %v1449_v60, %v1830_v51  ;;  %v784_v19 = vsel %vm722_vm4, %v689_v3, 0.0 }
 0x110   :  { %v531_v4 = vpop.f32.mrf.mxu0  ;;  %v779_v5 = vadd.f32 %v778_v59, %v777_v61 }
 0x111   :  { %v780_v7 = vsel %vm722_vm4, %v687_v1, 0.0  ;;  %v532_v11 = vadd.f32 %v1830_v51, %v531_v4  ;;  %v692_v22 = vmax.f32 %v540_v9, 0.0 }
 0x112   :  { %v1450_v13 = vpop.f32.mrf.mxu0  ;;  %v781_v15 = vadd.f32 %v780_v7, %v779_v5 }
 0x113   :  { %v690_v17 = vmax.f32 %v532_v11, 0.0  ;;  %v543_v18 = vadd.f32 %v1450_v13, %v1830_v51  ;;  %v795_v32 = vsel %vm722_vm4, %v692_v22, 0.0 }
 0x114   :  { %v534_v20 = vpop.f32.mrf.mxu0  ;;  %v783_v21 = vadd.f32 %v782_v12, %v781_v15 }
 0x115   :  { %v535_v24 = vadd.f32 %v1830_v51, %v534_v20  ;;  %v792_v27 = vsel %vm722_vm4, %v690_v17, 0.0  ;;  %v693_v28 = vmax.f32 %v543_v18, 0.0 }
 0x116   :  { %v1453_v25 = vpop.f32.mrf.mxu0  ;;  %v1966_v26 = vadd.f32 %v784_v19, %v783_v21 }
 0x117   :  { %v691_v30 = vmax.f32 %v535_v24, 0.0  ;;  %v556_v35 = vadd.f32 %v1453_v25, %v1830_v51  ;;  %v797_v39 = vsel %vm722_vm4, %v693_v28, 0.0 }
 0x118   :  { %v547_v31 = vpop.f32.mrf.mxu0 }
 0x119   :  { %v793_v33 = vsel %vm722_vm4, %v691_v30, 0.0  ;;  %v548_v36 = vadd.f32 %v1830_v51, %v547_v31  ;;  %v696_v44 = vmax.f32 %v556_v35, 0.0 }
 0x11a   :  { %v794_v37 = vadd.f32 %v793_v33, %v792_v27  ;;  %v1454_v38 = vpop.f32.mrf.mxu0 }
 0x11b   :  { %v694_v40 = vmax.f32 %v548_v36, 0.0  ;;  %v559_v0 = vadd.f32 %v1454_v38, %v1830_v51  ;;  %v803_v59 = vsel %vm722_vm4, %v696_v44, 0.0 }
 0x11c   :  { %v796_v42 = vadd.f32 %v795_v32, %v794_v37  ;;  %v550_v43 = vpop.f32.mrf.mxu0 }
 0x11d   :  { %v799_v45 = vsel %vm722_vm4, %v694_v40, 0.0  ;;  %v551_v46 = vadd.f32 %v1830_v51, %v550_v43  ;;  %v697_v52 = vmax.f32 %v559_v0, 0.0  ;;  %v596_v43 = vadd.f32 %v1830_v51, %v1832_v53 }
 0x11e   :  { %v798_v48 = vadd.f32 %v797_v39, %v796_v42  ;;  %v1457_v50 = vpop.f32.mrf.mxu0  ;;  %v607_v53 = vadd.f32 %v1836_v57, %v1830_v51  ;;  %v620_v57 = vadd.f32 %v1846_v2, %v1830_v51  ;;  %v631_v2 = vadd.f32 %v1830_v51, %v1884_v47 }
 0x11f   :  { %v695_v54 = vmax.f32 %v551_v46, 0.0  ;;  %v572_v61 = vadd.f32 %v1457_v50, %v1830_v51  ;;  %v805_v5 = vsel %vm722_vm4, %v697_v52, 0.0  ;;  %v644_v47 = vadd.f32 %v1830_v51, %v1890_v63 }
 0x120   :  { %v800_v55 = vadd.f32 %v799_v45, %v798_v48  ;;  %v563_v58 = vpop.f32.mrf.mxu0  ;;  %v599_v48 = vadd.f32 %v1830_v51, %v1843_v62  ;;  %v655_v63 = vadd.f32 %v1896_v6, %v1830_v51 }
 0x121   :  { %v801_v60 = vsel %vm722_vm4, %v695_v54, 0.0  ;;  %v564_v1 = vadd.f32 %v1830_v51, %v563_v58  ;;  %v700_v13 = vmax.f32 %v572_v61, 0.0  ;;  %v706_v58 = vmax.f32 %v596_v43, 0.0 }
 0x122   :  { %v802_v3 = vadd.f32 %v801_v60, %v800_v55  ;;  %v1458_v4 = vpop.f32.mrf.mxu0  ;;  %v604_v55 = vadd.f32 %v1821_v49, %v1830_v51  ;;  %v707_v61 = vmax.f32 %v599_v48, 0.0  ;;  %v615_v49 = vadd.f32 %v1830_v51, %v1867_v23 }
 0x123   :  { %v698_v7 = vmax.f32 %v564_v1, 0.0  ;;  %v575_v9 = vadd.f32 %v1458_v4, %v1830_v51  ;;  %v811_v25 = vsel %vm722_vm4, %v700_v13, 0.0  ;;  %v823_v62 = vsel %vm722_vm4, %v706_v58, 0.0 }
 0x124   :  { %v804_v11 = vadd.f32 %v803_v59, %v802_v3  ;;  %v566_v12 = vpop.f32.mrf.mxu0  ;;  %v708_v3 = vmax.f32 %v604_v55, 0.0  ;;  %v612_v4 = vadd.f32 %v1830_v51, %v1853_v8  ;;  %v623_v8 = vadd.f32 %v1859_v16, %v1830_v51 }
 0x125   :  { %v807_v15 = vsel %vm722_vm4, %v698_v7, 0.0  ;;  %v567_v17 = vadd.f32 %v1830_v51, %v566_v12  ;;  %v701_v20 = vmax.f32 %v575_v9, 0.0  ;;  %v709_v7 = vmax.f32 %v607_v53, 0.0 }
 0x126   :  { %v806_v18 = vadd.f32 %v805_v5, %v804_v11  ;;  %v1461_v19 = vpop.f32.mrf.mxu0  ;;  %v825_v9 = vsel %vm722_vm4, %v707_v61, 0.0  ;;  %v827_v12 = vsel %vm722_vm4, %v708_v3, 0.0  ;;  %v710_v13 = vmax.f32 %v612_v4, 0.0 }
 0x127   :  { %v699_v21 = vmax.f32 %v567_v17, 0.0  ;;  %v588_v28 = vadd.f32 %v1461_v19, %v1830_v51  ;;  %v813_v33 = vsel %vm722_vm4, %v701_v20, 0.0  ;;  %v829_v17 = vsel %vm722_vm4, %v709_v7, 0.0 }
 0x128   :  { %v808_v22 = vadd.f32 %v807_v15, %v806_v18  ;;  %v579_v24 = vpop.f32.mrf.mxu0  ;;  %v711_v18 = vmax.f32 %v615_v49, 0.0  ;;  %v712_v20 = vmax.f32 %v620_v57, 0.0  ;;  %v628_v23 = vadd.f32 %v1830_v51, %v1874_v34 }
 0x129   :  { %v809_v27 = vsel %vm722_vm4, %v699_v21, 0.0  ;;  %v580_v30 = vadd.f32 %v1830_v51, %v579_v24  ;;  %v704_v39 = vmax.f32 %v588_v28, 0.0  ;;  %v831_v21 = vsel %vm722_vm4, %v710_v13, 0.0 }
 0x12a   :  { %v810_v31 = vadd.f32 %v809_v27, %v808_v22  ;;  %v1462_v32 = vpop.f32.mrf.mxu0  ;;  %v713_v24 = vmax.f32 %v623_v8, 0.0  ;;  %v835_v28 = vsel %vm722_vm4, %v712_v20, 0.0  ;;  %v636_v16 = vadd.f32 %v1871_v29, %v1830_v51 }
 0x12b   :  { %v702_v35 = vmax.f32 %v580_v30, 0.0  ;;  %v591_v36 = vadd.f32 %v1462_v32, %v1830_v51  ;;  %v819_v50 = vsel %vm722_vm4, %v704_v39, 0.0  ;;  %v714_v30 = vmax.f32 %v628_v23, 0.0  ;;  %v1584_v23 = vld [vmem:[%s2069_s2 + $0x60] sm:$0xff]  }
 0x12c   :  { %v812_v37 = vadd.f32 %v811_v25, %v810_v31  ;;  %v582_v38 = vpop.f32.mrf.mxu0  ;;  %v833_v25 = vsel %vm722_vm4, %v711_v18, 0.0  ;;  %v837_v32 = vsel %vm722_vm4, %v713_v24, 0.0  ;;  %v639_v34 = vadd.f32 %v1880_v41, %v1830_v51 }
 0x12d   :  { %v815_v40 = vsel %vm722_vm4, %v702_v35, 0.0  ;;  %v583_v0 = vadd.f32 %v1830_v51, %v582_v38  ;;  %v705_v44 = vmax.f32 %v591_v36, 0.0  ;;  %v716_v36 = vmax.f32 %v636_v16, 0.0 }
 0x12e   :  { %v814_v42 = vadd.f32 %v813_v33, %v812_v37  ;;  %v715_v33 = vmax.f32 %v631_v2, 0.0  ;;  %v839_v37 = vsel %vm722_vm4, %v714_v30, 0.0  ;;  %v717_v39 = vmax.f32 %v639_v34, 0.0 }
 0x12f   :  { %v703_v45 = vmax.f32 %v583_v0, 0.0  ;;  %v821_v59 = vsel %vm722_vm4, %v705_v44, 0.0  ;;  %v647_v29 = vadd.f32 %v1830_v51, %v1900_v14  ;;  %v652_v41 = vadd.f32 %v1888_v56, %v1830_v51 }
 0x130   :  { %v816_v46 = vadd.f32 %v815_v40, %v814_v42  ;;  %v841_v40 = vsel %vm722_vm4, %v715_v33, 0.0  ;;  %v843_v42 = vsel %vm722_vm4, %v716_v36, 0.0  ;;  %v718_v43 = vmax.f32 %v644_v47, 0.0 }
 0x131   :  { %v817_v52 = vsel %vm722_vm4, %v703_v45, 0.0  ;;  %v786_v44 = vrot.slane %v1966_v26, 4  ;;  %v719_v48 = vmax.f32 %v647_v29, 0.0  ;;  %v721_v58 = vmax.f32 %v655_v63, 0.0 }
 0x132   :  { %v818_v54 = vadd.f32 %v817_v52, %v816_v46  ;;  %v845_v46 = vsel %vm722_vm4, %v717_v39, 0.0  ;;  %v720_v52 = vmax.f32 %v652_v41, 0.0  ;;  %v847_v14 = vsel %vm722_vm4, %v718_v43, 0.0 }
 0x133   :  { %v849_v56 = vsel %vm722_vm4, %v719_v48, 0.0 }
 0x134   :  { %v820_v60 = vadd.f32 %v819_v50, %v818_v54  ;;  %v787_v54 = vadd.f32 %v786_v44, %v1966_v26 }
 0x136   :  { %v822_v1 = vadd.f32 %v821_v59, %v820_v60  ;;  %v851_v60 = vsel %vm722_vm4, %v720_v52, 0.0  ;;  %v788_v53 = vrot.slane %v787_v54, 2 }
 0x138   :  { %v824_v5 = vadd.f32 %v823_v62, %v822_v1  ;;  %v853_v1 = vsel %vm722_vm4, %v721_v58, 0.0  ;;  %v789_v51 = vadd.f32 %v788_v53, %v787_v54 }
 0x13a   :  { %v826_v11 = vadd.f32 %v825_v9, %v824_v5  ;;  %v790_v4 = vrot.slane %v789_v51, 1 }
 0x13c   :  { %v828_v15 = vadd.f32 %v827_v12, %v826_v11  ;;  %v791_v9 = vadd.f32 %v790_v4, %v789_v51 }
 0x13e   :  { %v830_v19 = vadd.f32 %v829_v17, %v828_v15  ;;  %v862_v11 = vmul.f32 0.00390625, %v791_v9 }
 0x140   :  { %v832_v22 = vadd.f32 %v831_v21, %v830_v19  ;;  %v1583_v21 = vld [vmem:[%s2069_s2 + $0x68] sm:$0xff]   ;;  %s1260_s2 = sshll.u32 %s1612_s24, 4  ;;  %s1261_s2 = int_to_ptr.vmem [resolvable:$true] %s1260_s2 }
 0x141   :  { %s1585_s25 = scalar_lea.vmem %s1261_s2, 32  ;;  %p1590_p1 = scmp.lt.s32.totalorder %s1261_s2, %s1261_s2 }
 0x142   :  { %v834_v27 = vadd.f32 %v833_v25, %v832_v22  ;;  %v1343_v22 = vld [vmem:[%s2070_s3 + $0x4] ss:$0 sm:$0xff]  ;;  %p1586_p0 = scmp.ne.s32.totalorder %s1261_s2, %s1585_s25  ;;  %p1591_p2 = scmp.lt.s32.totalorder %s1585_s25, %s1585_s25 }
 0x144   :  { %v836_v31 = vadd.f32 %v835_v28, %v834_v27  ;;  %p1592_p3 = por %p1591_p2, %p1590_p1 }
 0x146   :  { %v838_v35 = vadd.f32 %v837_v32, %v836_v31  ;;  %p1593_p4 = pnand %p1592_p3, %p1586_p0 }
 0x148   :  { %v840_v38 = vadd.f32 %v839_v37, %v838_v35 }
 0x14a   :  { %v842_v0 = vadd.f32 %v841_v40, %v840_v38 }
 0x14c   :  { %v844_v45 = vadd.f32 %v843_v42, %v842_v0 }
 0x14e   :  { %v846_v50 = vadd.f32 %v845_v46, %v844_v45 }
 0x150   :  { %v848_v55 = vadd.f32 %v847_v14, %v846_v50 }
 0x152   :  { %v850_v59 = vadd.f32 %v849_v56, %v848_v55 }
 0x154   :  { %v852_v61 = vadd.f32 %v851_v60, %v850_v59 }
 0x156   :  { %v854_v3 = vadd.f32 %v853_v1, %v852_v61 }
 0x158   :  { %v855_v6 = vrot.slane %v854_v3, 4 }
 0x15a   :  { %v856_v62 = vadd.f32 %v855_v6, %v854_v3 }
 0x15c   :  { %v857_v5 = vrot.slane %v856_v62, 2 }
 0x15e   :  { %v858_v7 = vadd.f32 %v857_v5, %v856_v62 }
 0x160   :  { %v859_v26 = vrot.slane %v858_v7, 1 }
 0x162   :  { %v860_v49 = vadd.f32 %v859_v26, %v858_v7 }
 0x164   :  { %v863_v12 = vmul.f32 0.00390625, %v860_v49 }
 0x166   :  { %v1055_v57 = vsel %vm1054_vm5, %v863_v12, %v862_v11 }
 0x175   :  { %v1069_v15 = vpop.permute.xlu1 %1068 }
 0x179   :  { %v1061_v13 = vpop.permute.xlu0 %1060 }
 0x17a   :  { %v1071_v17 = vsel %vm722_vm4, %v1055_v57, %v1061_v13 }
 0x17d   :  { %v1065_v8 = vpop.permute.xlu0 %1064 }
 0x17e   :  { %v1073_v18 = vsel %vm1072_vm6, %v1071_v17, %v1065_v8 }
 0x17f   :  { %v1075_v19 = vsel %vm1074_vm7, %v1073_v18, %v1069_v15 }
 0x180   :  { %v1076_v20 = vpack.c.bf16 %v1075_v19, %v1075_v19 }
 0x182   :  { %1514 = vmatmul.mubr.bf16.vlgmr.msra.gmra.mxu1 %v1076_v20 }
 0x183   :  { %1521 = vmatprep.mubr.msk.bf16.mxu1 %vm1608_vm3, %v1607_v10  ;;  %1518 = vmatpush3.bf16.msra.mxu1 %v1583_v21 }
 0x184   :  { %1519 = vmatprep.subr.bf16.mxu1 %v1607_v10  ;;  %v1352_v10 = vld [vmem:[%s2070_s3 + $0x5] ss:$0 sm:$0xff] }
 0x187   :  { %1520 = vmatpush3.bf16.msra.mxu1 %v1584_v23 }
 0x242   :  { %v1180_v24 = vpop.f32.mrf.mxu1 }
 0x243   :  { %v1181_v25 = vadd.f32 %v1343_v22, %v1180_v24 }
 0x244   :  { %v1515_v2 = vpop.f32.mrf.mxu1 }
 0x245   :  { %v1186_v27 = vmax.f32 %v1181_v25, 0.0 }
 0x246   :  { %v1183_v28 = vpop.f32.mrf.mxu1 }
 0x247   :  { %v1187_v16 = vpack.c.bf16 %v1186_v27, %v1186_v27 }
 0x248   :  { %v1516_v30 = vpop.f32.mrf.mxu1 }
 0x249   :  { %1522 = vmatmul.mubr.msk.bf16.vlgmr.msra.gmra.mxu1 %vm722_vm4, %v1187_v16 }
 0x309   :  { %v1246_v31 = vpop.f32.mrf.mxu1 }
 0x30a   :  { %v1247_v32 = vadd.f32 %v1352_v10, %v1246_v31 }
 0x30b   :  { %v1523_v34 = vpop.f32.mrf.mxu1 }
 0x30c   :  { %1253 = vst.msk [vmem:[#allocation2] sm:$0x3] %vm1252_vm8, %v1247_v32 }
 0x30d   :  { %v1249_v33 = vpop.f32.mrf.mxu1 }
 0x30e   :  { %1596 = shalt.err (!%p1593_p4)
}
 0x30f   :  { %1263 = dma.vmem_to_hbm [thread:$0]  %s1261_s2, 32, %s2071_s4, [#allocation3]   ;;  %v1524_v35 = vpop.f32.mrf.mxu1 }
 0x310   :  { %1605 = dma.done.wait [#allocation3], 32  }
 0x311   :  { %1606 = vsyncadd [#allocation3], 4294967264 }
 0x312   :  { %1267 = vsyncpa [#allocation3], 1 }

</bundles_post_ra>
